<compile_context>
chip_gen: v6e
topology: v6e:2x2x1
jax: 0.10.0
libtpu: 0.0.40
codegen_flags: <defaults>
</compile_context>

<pallas_src>
import jax
import jax.numpy as jnp
import numpy as np
from jax.experimental import pallas as pl
from jax.experimental.pallas import tpu as pltpu

INPUT_DIM = 300
HIDDEN_DIM = 128
LAYERS = 1
OUTPUTS = 30
OUT_PAD = 128  # lane-dense padded output width


def recurrent_net_kernel(x_ref, win_ref, whh_ref, fc1_ref, w2_ref, bias_ref, out_ref):
    TB, D = x_ref.shape          # (T*B, D), time-major rows (t major, b minor)
    H = whh_ref.shape[0]
    B = out_ref.shape[0]
    T = TB // B

    # ---- hoisted input projection for both directions, biases folded in ----
    # proj[t*B + b, :H]  = x_t[b] @ W_ih_f^T + b_ih_f + b_hh_f
    # proj[t*B + b, H:]  = x_t[b] @ W_ih_b^T + b_ih_b + b_hh_b
    proj = (jnp.dot(x_ref[...], win_ref[...], preferred_element_type=jnp.float32)
            + bias_ref[0:1, :])                                      # (T*B, 2H)

    # ---- forward-direction recurrence; t = 0 peeled since h0 == 0 ----
    whh = whh_ref[...]
    h = jnp.tanh(proj[0:B, :H])
    for t in range(1, T):        # T is static -> fully unrolled (fine at T = 8)
        h = jnp.tanh(proj[t * B:(t + 1) * B, :H]
                     + jnp.dot(h, whh, preferred_element_type=jnp.float32))

    # ---- backward-direction hidden at the last output position (first bwd step) ----
    h_b = jnp.tanh(proj[(T - 1) * B:, H:])                           # (B, H)

    # ---- fc1 on concat([h, h_b]) as two matmuls (no lane concat), tanh ----
    h1 = jnp.tanh(jnp.dot(h, fc1_ref[:H, :], preferred_element_type=jnp.float32)
                  + jnp.dot(h_b, fc1_ref[H:, :], preferred_element_type=jnp.float32)
                  + bias_ref[1:2, :H])

    # ---- fc2 into a lane-dense (B, 128) output (cols >= OUTPUTS are zero-padded) ----
    out_ref[...] = (jnp.dot(h1, w2_ref[...], preferred_element_type=jnp.float32)
                    + bias_ref[1:2, H:])


def init_params(key, input_dim=INPUT_DIM, hidden_dim=HIDDEN_DIM, outputs=OUTPUTS):
    """Deterministic synthetic params with PyTorch-like shapes (weight = (out, in))."""
    ks = jax.random.split(key, 12)
    s = 1.0 / np.sqrt(hidden_dim)

    def u(k, shape):
        return jax.random.uniform(k, shape, jnp.float32, -s, s)

    return dict(
        w_ih_f=u(ks[0], (hidden_dim, input_dim)),    # weight_ih_l0
        w_hh_f=u(ks[1], (hidden_dim, hidden_dim)),   # weight_hh_l0
        b_ih_f=u(ks[2], (hidden_dim,)),
        b_hh_f=u(ks[3], (hidden_dim,)),
        w_ih_b=u(ks[4], (hidden_dim, input_dim)),    # weight_ih_l0_reverse
        w_hh_b=u(ks[5], (hidden_dim, hidden_dim)),   # weight_hh_l0_reverse (unused by fwd output)
        b_ih_b=u(ks[6], (hidden_dim,)),
        b_hh_b=u(ks[7], (hidden_dim,)),
        fc1_w=u(ks[8], (hidden_dim, 2 * hidden_dim)),
        fc1_b=u(ks[9], (hidden_dim,)),
        fc2_w=u(ks[10], (outputs, hidden_dim)),
        fc2_b=u(ks[11], (outputs,)),
    )


def recurrent_net_forward(x, p):
    """x: (B, T, D) float32 -> (B, OUTPUTS) float32, via a single Pallas kernel."""
    B, T, D = x.shape
    H = p["w_hh_f"].shape[0]
    O = p["fc2_w"].shape[0]

    # time-major then flatten so the hoisted projection is one big matmul row block;
    # time step t lives in the contiguous row slab [t*B, (t+1)*B).
    x_flat = jnp.transpose(x, (1, 0, 2)).reshape(T * B, D).astype(jnp.float32)

    # fused per-direction input-projection weight, pre-transposed to (in, out)
    w_in = jnp.concatenate([p["w_ih_f"].T, p["w_ih_b"].T], axis=1)          # (D, 2H)
    whh = p["w_hh_f"].T                                                     # (H, H)
    fc1_wT = p["fc1_w"].T                                                   # (2H, H)
    # fc2 padded to a lane-dense 128-wide output
    w2p = jnp.zeros((H, OUT_PAD), jnp.float32).at[:, :O].set(p["fc2_w"].T)  # (H, 128)
    b2p = jnp.zeros((OUT_PAD,), jnp.float32).at[:O].set(p["fc2_b"])

    # all biases packed in one (2, 2H) array:
    #   row 0 = [b_ih_f + b_hh_f | b_ih_b + b_hh_b]
    #   row 1 = [fc1_b           | fc2_b (padded)  ]
    bias_in = jnp.concatenate([p["b_ih_f"] + p["b_hh_f"],
                               p["b_ih_b"] + p["b_hh_b"]])                  # (2H,)
    bias_fc = jnp.concatenate([p["fc1_b"], b2p])                            # (2H,) since H == OUT_PAD
    biases = jnp.stack([bias_in, bias_fc], axis=0)                          # (2, 2H)

    vmem = pl.BlockSpec(memory_space=pltpu.MemorySpace.VMEM)
    out_padded = pl.pallas_call(
        recurrent_net_kernel,
        out_shape=jax.ShapeDtypeStruct((B, OUT_PAD), jnp.float32),
        in_specs=[vmem] * 6,
        out_specs=vmem,
    )(x_flat, w_in, whh, fc1_wT, w2p, biases)
    return out_padded[:, :O]


def reference_forward(x, p):
    """Pure-JAX reference matching PyTorch RecurrentNet.forward semantics."""
    B, T, D = x.shape
    H = p["w_hh_f"].shape[0]
    h = jnp.zeros((B, H), jnp.float32)
    for t in range(T):
        h = jnp.tanh(x[:, t, :] @ p["w_ih_f"].T + p["b_ih_f"]
                     + h @ p["w_hh_f"].T + p["b_hh_f"])
    h_b = jnp.tanh(x[:, -1, :] @ p["w_ih_b"].T + p["b_ih_b"] + p["b_hh_b"])
    feat = jnp.concatenate([h, h_b], axis=-1)                   # out[:, -1, :]
    h1 = jnp.tanh(feat @ p["fc1_w"].T + p["fc1_b"])
    return h1 @ p["fc2_w"].T + p["fc2_b"]


if __name__ == "__main__":
    B, T = 8, 8
    key = jax.random.PRNGKey(0)
    kx, kp = jax.random.split(key)
    x = jax.random.normal(kx, (B, T, INPUT_DIM), dtype=jnp.float32)
    params = init_params(kp)

    out = jax.block_until_ready(recurrent_net_forward(x, params))
    assert out.shape == (B, OUTPUTS)

    ref = reference_forward(x, params)
    np.testing.assert_allclose(np.asarray(out), np.asarray(ref), rtol=1e-4, atol=1e-4)

    print("KERNEL_OK")
</pallas_src>

<mosaic_0001>
module attributes {stable_mosaic.version = 11 : i64} {
  func.func @recurrent_net_kernel(%arg0: memref<64x300xf32, #tpu.memory_space<vmem>>, %arg1: memref<300x256xf32, #tpu.memory_space<vmem>>, %arg2: memref<128x128xf32, #tpu.memory_space<vmem>>, %arg3: memref<256x128xf32, #tpu.memory_space<vmem>>, %arg4: memref<128x128xf32, #tpu.memory_space<vmem>>, %arg5: memref<2x256xf32, #tpu.memory_space<vmem>>, %arg6: memref<8x128xf32, #tpu.memory_space<vmem>>) attributes {dimension_semantics = [], scalar_prefetch = 0 : i64, scratch_operands = 0 : i64, tpu.core_type = #tpu.core_type<tc>} {
    %c0 = arith.constant 0 : index
    %c0_0 = arith.constant 0 : index
    %0 = vector.load %arg0[%c0, %c0_0] : memref<64x300xf32, #tpu.memory_space<vmem>>, vector<64x300xf32>
    %c0_1 = arith.constant 0 : index
    %c0_2 = arith.constant 0 : index
    %1 = vector.load %arg1[%c0_1, %c0_2] : memref<300x256xf32, #tpu.memory_space<vmem>>, vector<300x256xf32>
    %cst = arith.constant dense<0.000000e+00> : vector<64x256xf32>
    %2 = tpu.matmul %0, %1, %cst {dimension_numbers = #tpu.dot_dimension_numbers<[1], [0], [0], [1], [0, 0, 1, 1], [], []>} : vector<64x300xf32>, vector<300x256xf32>, vector<64x256xf32> -> vector<64x256xf32>
    %c0_3 = arith.constant 0 : index
    %c0_4 = arith.constant 0 : index
    %3 = vector.load %arg5[%c0_3, %c0_4] : memref<2x256xf32, #tpu.memory_space<vmem>>, vector<1x256xf32>
    %4 = vector.broadcast %3 : vector<1x256xf32> to vector<64x256xf32>
    %5 = arith.addf %2, %4 : vector<64x256xf32>
    %c0_5 = arith.constant 0 : index
    %c0_6 = arith.constant 0 : index
    %6 = vector.load %arg2[%c0_5, %c0_6] : memref<128x128xf32, #tpu.memory_space<vmem>>, vector<128x128xf32>
    %7 = vector.extract_strided_slice %5 {offsets = [0, 0], sizes = [8, 128], strides = [1, 1]} : vector<64x256xf32> to vector<8x128xf32>
    %8 = math.tanh %7 : vector<8x128xf32>
    %9 = vector.extract_strided_slice %5 {offsets = [8, 0], sizes = [8, 128], strides = [1, 1]} : vector<64x256xf32> to vector<8x128xf32>
    %cst_7 = arith.constant dense<0.000000e+00> : vector<8x128xf32>
    %10 = tpu.matmul %8, %6, %cst_7 {dimension_numbers = #tpu.dot_dimension_numbers<[1], [0], [0], [1], [0, 0, 1, 1], [], []>} : vector<8x128xf32>, vector<128x128xf32>, vector<8x128xf32> -> vector<8x128xf32>
    %11 = arith.addf %9, %10 : vector<8x128xf32>
    %12 = math.tanh %11 : vector<8x128xf32>
    %13 = vector.extract_strided_slice %5 {offsets = [16, 0], sizes = [8, 128], strides = [1, 1]} : vector<64x256xf32> to vector<8x128xf32>
    %cst_8 = arith.constant dense<0.000000e+00> : vector<8x128xf32>
    %14 = tpu.matmul %12, %6, %cst_8 {dimension_numbers = #tpu.dot_dimension_numbers<[1], [0], [0], [1], [0, 0, 1, 1], [], []>} : vector<8x128xf32>, vector<128x128xf32>, vector<8x128xf32> -> vector<8x128xf32>
    %15 = arith.addf %13, %14 : vector<8x128xf32>
    %16 = math.tanh %15 : vector<8x128xf32>
    %17 = vector.extract_strided_slice %5 {offsets = [24, 0], sizes = [8, 128], strides = [1, 1]} : vector<64x256xf32> to vector<8x128xf32>
    %cst_9 = arith.constant dense<0.000000e+00> : vector<8x128xf32>
    %18 = tpu.matmul %16, %6, %cst_9 {dimension_numbers = #tpu.dot_dimension_numbers<[1], [0], [0], [1], [0, 0, 1, 1], [], []>} : vector<8x128xf32>, vector<128x128xf32>, vector<8x128xf32> -> vector<8x128xf32>
    %19 = arith.addf %17, %18 : vector<8x128xf32>
    %20 = math.tanh %19 : vector<8x128xf32>
    %21 = vector.extract_strided_slice %5 {offsets = [32, 0], sizes = [8, 128], strides = [1, 1]} : vector<64x256xf32> to vector<8x128xf32>
    %cst_10 = arith.constant dense<0.000000e+00> : vector<8x128xf32>
    %22 = tpu.matmul %20, %6, %cst_10 {dimension_numbers = #tpu.dot_dimension_numbers<[1], [0], [0], [1], [0, 0, 1, 1], [], []>} : vector<8x128xf32>, vector<128x128xf32>, vector<8x128xf32> -> vector<8x128xf32>
    %23 = arith.addf %21, %22 : vector<8x128xf32>
    %24 = math.tanh %23 : vector<8x128xf32>
    %25 = vector.extract_strided_slice %5 {offsets = [40, 0], sizes = [8, 128], strides = [1, 1]} : vector<64x256xf32> to vector<8x128xf32>
    %cst_11 = arith.constant dense<0.000000e+00> : vector<8x128xf32>
    %26 = tpu.matmul %24, %6, %cst_11 {dimension_numbers = #tpu.dot_dimension_numbers<[1], [0], [0], [1], [0, 0, 1, 1], [], []>} : vector<8x128xf32>, vector<128x128xf32>, vector<8x128xf32> -> vector<8x128xf32>
    %27 = arith.addf %25, %26 : vector<8x128xf32>
    %28 = math.tanh %27 : vector<8x128xf32>
    %29 = vector.extract_strided_slice %5 {offsets = [48, 0], sizes = [8, 128], strides = [1, 1]} : vector<64x256xf32> to vector<8x128xf32>
    %cst_12 = arith.constant dense<0.000000e+00> : vector<8x128xf32>
    %30 = tpu.matmul %28, %6, %cst_12 {dimension_numbers = #tpu.dot_dimension_numbers<[1], [0], [0], [1], [0, 0, 1, 1], [], []>} : vector<8x128xf32>, vector<128x128xf32>, vector<8x128xf32> -> vector<8x128xf32>
    %31 = arith.addf %29, %30 : vector<8x128xf32>
    %32 = math.tanh %31 : vector<8x128xf32>
    %33 = vector.extract_strided_slice %5 {offsets = [56, 0], sizes = [8, 128], strides = [1, 1]} : vector<64x256xf32> to vector<8x128xf32>
    %cst_13 = arith.constant dense<0.000000e+00> : vector<8x128xf32>
    %34 = tpu.matmul %32, %6, %cst_13 {dimension_numbers = #tpu.dot_dimension_numbers<[1], [0], [0], [1], [0, 0, 1, 1], [], []>} : vector<8x128xf32>, vector<128x128xf32>, vector<8x128xf32> -> vector<8x128xf32>
    %35 = arith.addf %33, %34 : vector<8x128xf32>
    %36 = math.tanh %35 : vector<8x128xf32>
    %37 = vector.extract_strided_slice %5 {offsets = [56, 128], sizes = [8, 128], strides = [1, 1]} : vector<64x256xf32> to vector<8x128xf32>
    %38 = math.tanh %37 : vector<8x128xf32>
    %c0_14 = arith.constant 0 : index
    %c0_15 = arith.constant 0 : index
    %39 = vector.load %arg3[%c0_14, %c0_15] : memref<256x128xf32, #tpu.memory_space<vmem>>, vector<128x128xf32>
    %cst_16 = arith.constant dense<0.000000e+00> : vector<8x128xf32>
    %40 = tpu.matmul %36, %39, %cst_16 {dimension_numbers = #tpu.dot_dimension_numbers<[1], [0], [0], [1], [0, 0, 1, 1], [], []>} : vector<8x128xf32>, vector<128x128xf32>, vector<8x128xf32> -> vector<8x128xf32>
    %c128 = arith.constant 128 : index
    %c0_17 = arith.constant 0 : index
    %41 = vector.load %arg3[%c128, %c0_17] : memref<256x128xf32, #tpu.memory_space<vmem>>, vector<128x128xf32>
    %cst_18 = arith.constant dense<0.000000e+00> : vector<8x128xf32>
    %42 = tpu.matmul %38, %41, %cst_18 {dimension_numbers = #tpu.dot_dimension_numbers<[1], [0], [0], [1], [0, 0, 1, 1], [], []>} : vector<8x128xf32>, vector<128x128xf32>, vector<8x128xf32> -> vector<8x128xf32>
    %43 = arith.addf %40, %42 : vector<8x128xf32>
    %c1 = arith.constant 1 : index
    %c0_19 = arith.constant 0 : index
    %44 = vector.load %arg5[%c1, %c0_19] : memref<2x256xf32, #tpu.memory_space<vmem>>, vector<1x128xf32>
    %45 = vector.broadcast %44 : vector<1x128xf32> to vector<8x128xf32>
    %46 = arith.addf %43, %45 : vector<8x128xf32>
    %47 = math.tanh %46 : vector<8x128xf32>
    %c0_20 = arith.constant 0 : index
    %c0_21 = arith.constant 0 : index
    %48 = vector.load %arg4[%c0_20, %c0_21] : memref<128x128xf32, #tpu.memory_space<vmem>>, vector<128x128xf32>
    %cst_22 = arith.constant dense<0.000000e+00> : vector<8x128xf32>
    %49 = tpu.matmul %47, %48, %cst_22 {dimension_numbers = #tpu.dot_dimension_numbers<[1], [0], [0], [1], [0, 0, 1, 1], [], []>} : vector<8x128xf32>, vector<128x128xf32>, vector<8x128xf32> -> vector<8x128xf32>
    %c1_23 = arith.constant 1 : index
    %c128_24 = arith.constant 128 : index
    %50 = vector.load %arg5[%c1_23, %c128_24] : memref<2x256xf32, #tpu.memory_space<vmem>>, vector<1x128xf32>
    %51 = vector.broadcast %50 : vector<1x128xf32> to vector<8x128xf32>
    %52 = arith.addf %49, %51 : vector<8x128xf32>
    %c0_25 = arith.constant 0 : index
    %c0_26 = arith.constant 0 : index
    %53 = vector.load %arg6[%c0_25, %c0_26] : memref<8x128xf32, #tpu.memory_space<vmem>>, vector<8x128xf32>
    tpu.vector_store %arg6[%c0_25, %c0_26], %52 {strides = array<i32>} : memref<8x128xf32, #tpu.memory_space<vmem>>, vector<8x128xf32>,
    return
  }
}

</mosaic_0001>

<bundles_post_ra>
// kernel: tpu_custom_call.1
= control target key start
LH: loop header
LB: loop body
LE: loop exit
PB: predicated region body
PF: predicated region fallthrough
CT: control target
= control target key end

     0   :  { %11 = vsyncpa [#allocation3], 0  ;;  %s2425_s0 = inlined_call_operand.hbm [shape: f32[64,300], index: 0, kind: input, shape index: {}]   ;;  %s2426_s1 = inlined_call_operand.hbm [shape: f32[300,256], index: 1, kind: input, shape index: {}]   ;;  %s2427_s2 = inlined_call_operand.hbm [shape: f32[128,128], index: 2, kind: input, shape index: {}]   ;;  %s2428_s3 = inlined_call_operand.hbm [shape: f32[256,128], index: 3, kind: input, shape index: {}]   ;;  %s2429_s4 = inlined_call_operand.hbm [shape: f32[128,128], index: 4, kind: input, shape index: {}]   ;;  %s2430_s5 = inlined_call_operand.vmem [shape: f32[2,256], index: 5, kind: input, shape index: {}]   ;;  %s2431_s6 = inlined_call_operand.hbm [shape: f32[8,128], index: 6, kind: output, shape index: {}]  }
   0x1   :  { %12 = vsyncpa [#allocation6], 0 }
   0x2   :  { %13 = vsyncpa [#allocation9], 0 }
   0x3   :  { %14 = vsyncpa [#allocation4], 0  ;;  %s1952_s21 = smov [#allocation5]  }
   0x4   :  { %s32_s22 = sshll.u32 %s1952_s21, 4  ;;  %s33_s22 = int_to_ptr.vmem [resolvable:$true] %s32_s22 }
   0x5   :  { %s1832_s23 = scalar_lea.vmem %s33_s22, 9728  ;;  %p1837_p1 = scmp.lt.s32.totalorder %s33_s22, %s33_s22 }
   0x6   :  { %p1833_p0 = scmp.ne.s32.totalorder %s33_s22, %s1832_s23  ;;  %p1838_p2 = scmp.lt.s32.totalorder %s1832_s23, %s1832_s23 }
   0x8   :  { %p1839_p3 = por %p1838_p2, %p1837_p1 }
   0xa   :  { %p1840_p4 = pnand %p1839_p3, %p1833_p0 }
   0xc   :  { %1843 = shalt.err (!%p1840_p4)
}
   0xd   :  { %s1953_s24 = smov 256   ;;  %s1954_s25 = smov 16  }
   0xe   :  { %38 = dma.hbm_to_vmem [thread:$0]  %s2426_s1, 9728, %s33_s22, [#allocation6], %s1953_s24, %s1953_s24, %s1954_s25  }
   0xf   :  { %s1955_s28 = smov [#allocation8]   ;;  %s1956_s30 = smov [#allocation2]  }
  0x10   :  { %s56_s29 = sshll.u32 %s1955_s28, 4  ;;  %s20_s7 = sshll.u32 %s1956_s30, 4  ;;  %s57_s29 = int_to_ptr.vmem [resolvable:$true] %s56_s29  ;;  %s21_s7 = int_to_ptr.vmem [resolvable:$true] %s20_s7 }
  0x11   :  { %s1852_s8 = scalar_lea.vmem %s57_s29, 4096  ;;  %p1857_p6 = scmp.lt.s32.totalorder %s57_s29, %s57_s29 }
  0x12   :  { %p1853_p5 = scmp.ne.s32.totalorder %s57_s29, %s1852_s8  ;;  %p1858_p7 = scmp.lt.s32.totalorder %s1852_s8, %s1852_s8 }
  0x14   :  { %p1859_p8 = por %p1858_p7, %p1857_p6 }
  0x16   :  { %p1860_p9 = pnand %p1859_p8, %p1853_p5 }
  0x18   :  { %1863 = shalt.err (!%p1860_p9)
}
  0x19   :  { %s1957_s9 = smov 128   ;;  %s1958_s10 = smov 8  }
  0x1a   :  { %62 = dma.hbm_to_vmem [thread:$0]  %s2428_s3, 4096, %s57_s29, [#allocation9], %s1957_s9, %s1957_s9, %s1958_s10  }
  0x1b   :  { %s1872_s1 = scalar_lea.vmem %s21_s7, 3072  ;;  %p1877_p11 = scmp.lt.s32.totalorder %s21_s7, %s21_s7 }
  0x1c   :  { %p1873_p10 = scmp.ne.s32.totalorder %s21_s7, %s1872_s1  ;;  %p1878_p12 = scmp.lt.s32.totalorder %s1872_s1, %s1872_s1 }
  0x1e   :  { %p1879_p13 = por %p1878_p12, %p1877_p11 }
  0x20   :  { %p1880_p0 = pnand %p1879_p13, %p1873_p10 }
  0x22   :  { %1883 = shalt.err (!%p1880_p0)
}
  0x23   :  { %s1959_s13 = smov 384   ;;  %s1960_s14 = smov 24  }
  0x24   :  { %26 = dma.hbm_to_vmem [thread:$0]  %s2425_s0, 3072, %s21_s7, [#allocation3], %s1959_s13, %s1959_s13, %s1960_s14  }
  0x25   :  { %s1961_s17 = smov [#allocation7]   ;;  %s1962_s19 = smov [#allocation10]  }
  0x26   :  { %s44_s18 = sshll.u32 %s1961_s17, 4  ;;  %s68_s20 = sshll.u32 %s1962_s19, 4  ;;  %s45_s18 = int_to_ptr.vmem [resolvable:$true] %s44_s18  ;;  %s69_s20 = int_to_ptr.vmem [resolvable:$true] %s68_s20 }
  0x27   :  { %s1892_s3 = scalar_lea.vmem %s45_s18, 2048  ;;  %p1897_p2 = scmp.lt.s32.totalorder %s45_s18, %s45_s18 }
  0x28   :  { %p1893_p1 = scmp.ne.s32.totalorder %s45_s18, %s1892_s3  ;;  %p1898_p3 = scmp.lt.s32.totalorder %s1892_s3, %s1892_s3 }
  0x2a   :  { %p1899_p4 = por %p1898_p3, %p1897_p2 }
  0x2c   :  { %p1900_p5 = pnand %p1899_p4, %p1893_p1 }
  0x2e   :  { %1903 = shalt.err (!%p1900_p5)
}
  0x2f   :  { %50 = dma.hbm_to_vmem [thread:$0]  %s2427_s2, 2048, %s45_s18, [#allocation6], %s1957_s9, %s1957_s9, %s1958_s10  }
  0x30   :  { %s1912_s0 = scalar_lea.vmem %s69_s20, 2048  ;;  %p1917_p7 = scmp.lt.s32.totalorder %s69_s20, %s69_s20 }
  0x31   :  { %p1913_p6 = scmp.ne.s32.totalorder %s69_s20, %s1912_s0  ;;  %p1918_p8 = scmp.lt.s32.totalorder %s1912_s0, %s1912_s0 }
  0x33   :  { %p1919_p9 = por %p1918_p8, %p1917_p7 }
  0x35   :  { %p1920_p10 = pnand %p1919_p9, %p1913_p6 }
  0x37   :  { %1923 = shalt.err (!%p1920_p10)
}
  0x38   :  { %74 = dma.hbm_to_vmem [thread:$0]  %s2429_s4, 2048, %s69_s20, [#allocation9], %s1957_s9, %s1957_s9, %s1958_s10  }
  0x39   :  { %1944 = dma.done.wait [#allocation3], 3072  }
  0x3a   :  { %1945 = vsyncadd [#allocation3], 4294964224 }
  0x3b   :  { %1946 = dma.done.wait [#allocation6], 11776  }
  0x3c   :  { %1947 = vsyncadd [#allocation6], 4294955520 }
  0x3d   :  { %1948 = dma.done.wait [#allocation9], 6144  }
  0x3e   :  { %1949 = vsyncadd [#allocation9], 4294961152  ;;  %v1963_v0 = vmov 0.0   ;;  %v147_v1 = vld [vmem:[#allocation5 + $0xf8] sm:$0xff]  ;;  %v146_v2 = vld [vmem:[#allocation5 + $0xf0] sm:$0xff]  ;;  %vm229_vm0 = vcmask 1043456  }
  0x3f   :  { %406 = vmatprep.mubr.f32.mxu1 %v1963_v0  ;;  %v145_v3 = vld [vmem:[#allocation5 + $0xe8] sm:$0xff]  ;;  %236 = vmatprep.subr.mxu0 %v147_v1  ;;  %v144_v4 = vld [vmem:[#allocation5 + $0xe0] sm:$0xff]  ;;  %v143_v5 = vld [vmem:[#allocation5 + $0xd8] sm:$0xff]  ;;  %vm204_vm1 = vcmask 359424   ;;  %vm1964_vm2 = vmmov 0   ;;  %s1965_s29 = smov [#allocation11]  }
  0x40   :  { %237 = vmatpush1.msra.mxu0 %v146_v2  ;;  %v142_v6 = vld [vmem:[#allocation5 + $0xd0] sm:$0xff]  ;;  %v141_v7 = vld [vmem:[#allocation5 + $0xc8] sm:$0xff]  ;;  %v140_v8 = vld [vmem:[#allocation5 + $0xc0] sm:$0xff]  ;;  %s1247_s30 = sshll.u32 %s1965_s29, 4  ;;  %s1248_s30 = int_to_ptr.vmem [resolvable:$true] %s1247_s30 }
  0x41   :  { %238 = vmatprep.subr.mxu0 %v145_v3  ;;  %v139_v9 = vld [vmem:[#allocation5 + $0xb8] sm:$0xff]  ;;  %v138_v10 = vld [vmem:[#allocation5 + $0xb0] sm:$0xff]  ;;  %v137_v11 = vld [vmem:[#allocation5 + $0xa8] sm:$0xff]  ;;  %s1924_s7 = scalar_lea.vmem %s1248_s30, 128  ;;  %p1929_p12 = scmp.lt.s32.totalorder %s1248_s30, %s1248_s30 }
  0x42   :  { %239 = vmatpush1.msra.mxu0 %v144_v4  ;;  %v136_v12 = vld [vmem:[#allocation5 + $0xa0] sm:$0xff]  ;;  %v135_v13 = vld [vmem:[#allocation5 + $0x98] sm:$0xff]  ;;  %v134_v14 = vld [vmem:[#allocation5 + $0x90] sm:$0xff]  ;;  %p1925_p11 = scmp.ne.s32.totalorder %s1248_s30, %s1924_s7  ;;  %p1930_p13 = scmp.lt.s32.totalorder %s1924_s7, %s1924_s7 }
  0x43   :  { %240 = vmatprep.subr.mxu0 %v143_v5  ;;  %v133_v15 = vld [vmem:[#allocation5 + $0x88] sm:$0xff]  ;;  %v132_v16 = vld [vmem:[#allocation5 + $0x80] sm:$0xff]  ;;  %v131_v17 = vld [vmem:[#allocation5 + $0x78] sm:$0xff] }
  0x44   :  { %241 = vmatpush1.msra.mxu0 %v142_v6  ;;  %v130_v18 = vld [vmem:[#allocation5 + $0x70] sm:$0xff]  ;;  %v129_v19 = vld [vmem:[#allocation5 + $0x68] sm:$0xff]  ;;  %v128_v20 = vld [vmem:[#allocation5 + $0x60] sm:$0xff]  ;;  %p1931_p0 = por %p1930_p13, %p1929_p12 }
  0x45   :  { %242 = vmatprep.subr.mxu0 %v141_v7  ;;  %v191_v21 = vld [vmem:[#allocation5 + $0x258] sm:$0xf]  ;;  %v190_v23 = vld [vmem:[#allocation5 + $0x250] sm:$0xf]  ;;  %v189_v25 = vld [vmem:[#allocation5 + $0x248] sm:$0xff] }
  0x46   :  { %243 = vmatpush1.msra.mxu0 %v140_v8  ;;  %v127_v22 = vld [vmem:[#allocation5 + $0x58] sm:$0xff]  ;;  %1258 = vmatprep.subr.msk.mxu1 %vm229_vm0, %v191_v21  ;;  %v126_v24 = vld [vmem:[#allocation5 + $0x50] sm:$0xff]  ;;  %v188_v26 = vld [vmem:[#allocation5 + $0x240] sm:$0xff]  ;;  %p1932_p1 = pnand %p1931_p0, %p1925_p11 }
  0x47   :  { %244 = vmatprep.subr.mxu0 %v139_v9  ;;  %1259 = vmatpush1.msk.msra.mxu1 %vm229_vm0, %v190_v23  ;;  %v125_v27 = vld [vmem:[#allocation5 + $0x48] sm:$0xff]  ;;  %v187_v28 = vld [vmem:[#allocation5 + $0x238] sm:$0xff]  ;;  %v124_v29 = vld [vmem:[#allocation5 + $0x40] sm:$0xff] }
  0x48   :  { %245 = vmatpush1.msra.mxu0 %v138_v10  ;;  %364 = vmatprep.subr.mxu1 %v189_v25  ;;  %v186_v30 = vld [vmem:[#allocation5 + $0x230] sm:$0xff]  ;;  %v185_v31 = vld [vmem:[#allocation5 + $0x228] sm:$0xff]  ;;  %v123_v32 = vld [vmem:[#allocation5 + $0x38] sm:$0xff] }
  0x49   :  { %246 = vmatprep.subr.mxu0 %v137_v11  ;;  %365 = vmatpush1.msra.mxu1 %v188_v26  ;;  %v184_v33 = vld [vmem:[#allocation5 + $0x220] sm:$0xff]  ;;  %v122_v34 = vld [vmem:[#allocation5 + $0x30] sm:$0xff]  ;;  %v183_v35 = vld [vmem:[#allocation5 + $0x218] sm:$0xff] }
  0x4a   :  { %247 = vmatpush1.msra.mxu0 %v136_v12  ;;  %366 = vmatprep.subr.mxu1 %v187_v28  ;;  %v121_v36 = vld [vmem:[#allocation5 + $0x28] sm:$0xff]  ;;  %v182_v37 = vld [vmem:[#allocation5 + $0x210] sm:$0xff]  ;;  %v120_v38 = vld [vmem:[#allocation5 + $0x20] sm:$0xff] }
  0x4b   :  { %248 = vmatprep.subr.mxu0 %v135_v13  ;;  %367 = vmatpush1.msra.mxu1 %v186_v30  ;;  %v181_v39 = vld [vmem:[#allocation5 + $0x208] sm:$0xff]  ;;  %v119_v40 = vld [vmem:[#allocation5 + $0x18] sm:$0xff]  ;;  %v118_v42 = vld [vmem:[#allocation5 + $0x10] sm:$0xff] }
  0x4c   :  { %249 = vmatpush1.msra.mxu0 %v134_v14  ;;  %368 = vmatprep.subr.mxu1 %v185_v31  ;;  %v93_v41 = vld [vmem:[#allocation2 + $0x8] sm:$0xff]  ;;  %v180_v43 = vld [vmem:[#allocation5 + $0x200] sm:$0xff]  ;;  %v94_v45 = vld [vmem:[#allocation2 + $0x10] sm:$0xff] }
  0x4d   :  { %250 = vmatprep.subr.mxu0 %v133_v15  ;;  %369 = vmatpush1.msra.mxu1 %v184_v33  ;;  %v117_v44 = vld [vmem:[#allocation5 + $0x8] sm:$0xff]  ;;  %v116_v46 = vld [vmem:[#allocation5] sm:$0xff]  ;;  %v179_v47 = vld [vmem:[#allocation5 + $0x1f8] sm:$0xff] }
  0x4e   :  { %251 = vmatpush1.msra.mxu0 %v132_v16  ;;  %370 = vmatprep.subr.mxu1 %v183_v35  ;;  %v2026_v48 = vld [vmem:[#allocation7 + $0x78] sm:$0xff]  ;;  %v178_v49 = vld [vmem:[#allocation5 + $0x1f0] sm:$0xff]  ;;  %v177_v50 = vld [vmem:[#allocation5 + $0x1e8] sm:$0xff] }
  0x4f   :  { %252 = vmatprep.subr.mxu0 %v131_v17  ;;  %371 = vmatpush1.msra.mxu1 %v182_v37  ;;  %v176_v51 = vld [vmem:[#allocation5 + $0x1e0] sm:$0xff]  ;;  %v97_v52 = vld [vmem:[#allocation2 + $0x28] sm:$0xff]  ;;  %v175_v53 = vld [vmem:[#allocation5 + $0x1d8] sm:$0xff] }
  0x50   :  { %253 = vmatpush1.msra.mxu0 %v130_v18  ;;  %372 = vmatprep.subr.mxu1 %v181_v39  ;;  %v2032_v54 = vld [vmem:[#allocation7 + $0x70] sm:$0xff]  ;;  %v173_v56 = vld [vmem:[#allocation5 + $0x1c8] sm:$0xff]  ;;  %v172_v58 = vld [vmem:[#allocation5 + $0x1c0] sm:$0xff] }
  0x51   :  { %254 = vmatprep.subr.mxu0 %v129_v19  ;;  %300 = vmatprep.mubr.f32.mxu0 %v93_v41  ;;  %v174_v55 = vld [vmem:[#allocation5 + $0x1d0] sm:$0xff]  ;;  %v2036_v57 = vld [vmem:[#allocation7 + $0x68] sm:$0xff]  ;;  %v171_v59 = vld [vmem:[#allocation5 + $0x1b8] sm:$0xff] }
  0x52   :  { %255 = vmatpush1.msra.mxu0 %v128_v20  ;;  %373 = vmatpush1.msra.mxu1 %v180_v43  ;;  %v170_v60 = vld [vmem:[#allocation5 + $0x1b0] sm:$0xff]  ;;  %v100_v61 = vld [vmem:[#allocation2 + $0x40] sm:$0xff]  ;;  %v169_v62 = vld [vmem:[#allocation5 + $0x1a8] sm:$0xff] }
  0x53   :  { %256 = vmatprep.subr.mxu0 %v127_v22  ;;  %1260 = vmatmul.mubr.msk.f32.vlgmr.msra.gmra.mxu1 %vm204_vm1, %v94_v45  ;;  %v2042_v63 = vld [vmem:[#allocation7 + $0x60] sm:$0xff]  ;;  %v167_v2 = vld [vmem:[#allocation5 + $0x198] sm:$0xff]  ;;  %v166_v4 = vld [vmem:[#allocation5 + $0x190] sm:$0xff] }
  0x54   :  { %257 = vmatpush1.msra.mxu0 %v126_v24  ;;  %1440 = vmatprep.subr.mxu1 %v1963_v0  ;;  %v168_v1 = vld [vmem:[#allocation5 + $0x1a0] sm:$0xff]  ;;  %v2046_v3 = vld [vmem:[#allocation7 + $0x58] sm:$0xff]  ;;  %v165_v5 = vld [vmem:[#allocation5 + $0x188] sm:$0xff] }
  0x55   :  { %258 = vmatprep.subr.mxu0 %v125_v27  ;;  %1441 = vmatpush3.msra.mxu1 %v2026_v48  ;;  %v164_v6 = vld [vmem:[#allocation5 + $0x180] sm:$0xff]  ;;  %v103_v7 = vld [vmem:[#allocation2 + $0x58] sm:$0xff]  ;;  %v2052_v9 = vld [vmem:[#allocation7 + $0x50] sm:$0xff] }
  0x56   :  { %259 = vmatpush1.msra.mxu0 %v124_v29  ;;  %411 = vmatprep.mubr.f32.mxu1 %v1963_v0  ;;  %v163_v8 = vld [vmem:[#allocation5 + $0x178] sm:$0xff]  ;;  %v162_v10 = vld [vmem:[#allocation5 + $0x170] sm:$0xff]  ;;  %v161_v11 = vld [vmem:[#allocation5 + $0x168] sm:$0xff] }
  0x57   :  { %260 = vmatprep.subr.mxu0 %v123_v32  ;;  %1442 = vmatprep.subr.mxu1 %v1963_v0  ;;  %v2056_v12 = vld [vmem:[#allocation7 + $0x48] sm:$0xff]  ;;  %v160_v13 = vld [vmem:[#allocation5 + $0x160] sm:$0xff]  ;;  %v159_v14 = vld [vmem:[#allocation5 + $0x158] sm:$0xff] }
  0x58   :  { %261 = vmatpush1.msra.mxu0 %v122_v34  ;;  %1261 = vmatmul.mubr.msk.f32.gmra.mxu1 %vm204_vm1, %v97_v52  ;;  %v158_v15 = vld [vmem:[#allocation5 + $0x150] sm:$0xff]  ;;  %v157_v16 = vld [vmem:[#allocation5 + $0x148] sm:$0xff]  ;;  %v156_v17 = vld [vmem:[#allocation5 + $0x140] sm:$0xff] }
  0x59   :  { %262 = vmatprep.subr.mxu0 %v121_v36  ;;  %1443 = vmatpush3.msra.mxu1 %v2032_v54  ;;  %v155_v18 = vld [vmem:[#allocation5 + $0x138] sm:$0xff]  ;;  %v154_v19 = vld [vmem:[#allocation5 + $0x130] sm:$0xff]  ;;  %v153_v20 = vld [vmem:[#allocation5 + $0x128] sm:$0xff] }
  0x5a   :  { %263 = vmatpush1.msra.mxu0 %v120_v38  ;;  %1444 = vmatprep.subr.mxu1 %v1963_v0  ;;  %v152_v21 = vld [vmem:[#allocation5 + $0x120] sm:$0xff]  ;;  %v151_v22 = vld [vmem:[#allocation5 + $0x118] sm:$0xff]  ;;  %v150_v23 = vld [vmem:[#allocation5 + $0x110] sm:$0xff] }
  0x5b   :  { %264 = vmatprep.subr.mxu0 %v119_v40  ;;  %1445 = vmatpush3.msra.mxu1 %v2036_v57  ;;  %v149_v24 = vld [vmem:[#allocation5 + $0x108] sm:$0xff]  ;;  %v148_v25 = vld [vmem:[#allocation5 + $0x100] sm:$0xff]  ;;  %v95_v28 = vld [vmem:[#allocation2 + $0x18] sm:$0xff] }
  0x5c   :  { %265 = vmatpush1.msra.mxu0 %v118_v42  ;;  %416 = vmatprep.mubr.f32.mxu1 %v1963_v0  ;;  %v92_v26 = vld [vmem:[#allocation2] sm:$0xff]  ;;  %v99_v29 = vld [vmem:[#allocation2 + $0x38] sm:$0xff]  ;;  %v98_v30 = vld [vmem:[#allocation2 + $0x30] sm:$0xff] }
  0x5d   :  { %266 = vmatprep.subr.mxu0 %v117_v44  ;;  %1446 = vmatprep.subr.mxu1 %v1963_v0  ;;  %v96_v27 = vld [vmem:[#allocation2 + $0x20] sm:$0xff]  ;;  %v102_v31 = vld [vmem:[#allocation2 + $0x50] sm:$0xff]  ;;  %v101_v32 = vld [vmem:[#allocation2 + $0x48] sm:$0xff] }
  0x5e   :  { %267 = vmatpush1.msra.mxu0 %v116_v46  ;;  %1262 = vmatmul.mubr.msk.f32.gmra.mxu1 %vm204_vm1, %v100_v61  ;;  %v105_v33 = vld [vmem:[#allocation2 + $0x68] sm:$0xff]  ;;  %v104_v34 = vld [vmem:[#allocation2 + $0x60] sm:$0xff]  ;;  %v106_v35 = vld [vmem:[#allocation2 + $0x70] sm:$0xff] }
  0x5f   :  { %268 = vmatprep.subr.mxu0 %v179_v47  ;;  %1447 = vmatpush3.msra.mxu1 %v2042_v63  ;;  %v2079_v36 = vld [vmem:[#allocation7 + $0x40] sm:$0xff]  ;;  %v107_v38 = vld [vmem:[#allocation2 + $0x78] sm:$0xff]  ;;  %v109_v40 = vld [vmem:[#allocation2 + $0x88] sm:$0xff] }
  0x60   :  { %269 = vmatpush2.msra.mxu0 %v178_v49  ;;  %1448 = vmatprep.subr.mxu1 %v1963_v0  ;;  %v108_v37 = vld [vmem:[#allocation2 + $0x80] sm:$0xff]  ;;  %v2083_v39 = vld [vmem:[#allocation7 + $0x38] sm:$0xff]  ;;  %v2089_v41 = vld [vmem:[#allocation7 + $0x30] sm:$0xff] }
  0x61   :  { %270 = vmatprep.subr.mxu0 %v177_v50  ;;  %1449 = vmatpush3.msra.mxu1 %v2046_v3  ;;  %v111_v42 = vld [vmem:[#allocation2 + $0x98] sm:$0xff]  ;;  %v110_v43 = vld [vmem:[#allocation2 + $0x90] sm:$0xff]  ;;  %v2092_v44 = vld [vmem:[#allocation7 + $0x28] sm:$0xff] }
  0x62   :  { %271 = vmatpush2.msra.mxu0 %v176_v51  ;;  %421 = vmatprep.mubr.f32.mxu1 %v1963_v0  ;;  %v112_v45 = vld [vmem:[#allocation2 + $0xa0] sm:$0xff]  ;;  %v114_v47 = vld [vmem:[#allocation2 + $0xb0] sm:$0xff]  ;;  %v113_v49 = vld [vmem:[#allocation2 + $0xa8] sm:$0xff] }
  0x63   :  { %272 = vmatprep.subr.mxu0 %v175_v53  ;;  %1450 = vmatprep.subr.mxu1 %v1963_v0  ;;  %v2095_v46 = vld [vmem:[#allocation7 + $0x20] sm:$0xff]  ;;  %v2101_v50 = vld [vmem:[#allocation7 + $0x18] sm:$0xff]  ;;  %v2105_v52 = vld [vmem:[#allocation7 + $0x10] sm:$0xff] }
  0x64   :  { %273 = vmatpush2.msra.mxu0 %v174_v55  ;;  %1263 = vmatmul.mubr.msk.f32.gmra.mxu1 %vm204_vm1, %v103_v7  ;;  %v115_v51 = vld [vmem:[#allocation2 + $0xb8] sm:$0xff]  ;;  %v2111_v53 = vld [vmem:[#allocation7 + $0x8] sm:$0xff]  ;;  %v2117_v55 = vld [vmem:[#allocation7] sm:$0xff] }
  0x65   :  { %274 = vmatprep.subr.mxu0 %v173_v56  ;;  %1451 = vmatpush3.msra.mxu1 %v2052_v9  ;;  %v2149_v7 = vld [vmem:[%s2430_s5] ss:$2 sm:$0x3] }
  0x66   :  { %275 = vmatpush2.msra.mxu0 %v172_v58  ;;  %1452 = vmatprep.subr.mxu1 %v1963_v0 }
  0x67   :  { %276 = vmatprep.subr.mxu0 %v171_v59  ;;  %1453 = vmatpush3.msra.mxu1 %v2056_v12 }
  0x68   :  { %277 = vmatpush2.msra.mxu0 %v170_v60  ;;  %426 = vmatprep.mubr.f32.mxu1 %v1963_v0 }
  0x69   :  { %278 = vmatprep.subr.mxu0 %v169_v62  ;;  %1454 = vmatprep.subr.mxu1 %v1963_v0 }
  0x6a   :  { %279 = vmatpush2.msra.mxu0 %v168_v1  ;;  %1264 = vmatmul.mubr.msk.f32.gmra.mxu1 %vm204_vm1, %v106_v35 }
  0x6b   :  { %280 = vmatprep.subr.mxu0 %v167_v2  ;;  %1455 = vmatpush3.msra.mxu1 %v2079_v36  ;;  %v194_v2 = vlaneseq }
  0x6c   :  { %281 = vmatpush2.msra.mxu0 %v166_v4  ;;  %1456 = vmatprep.subr.mxu1 %v1963_v0 }
  0x6d   :  { %282 = vmatprep.subr.mxu0 %v165_v5  ;;  %1457 = vmatpush3.msra.mxu1 %v2083_v39  ;;  %v2143_v5 = vshrl.u32 %v194_v2, 7 }
  0x6e   :  { %283 = vmatpush2.msra.mxu0 %v164_v6  ;;  %431 = vmatprep.mubr.f32.mxu1 %v1963_v0 }
  0x6f   :  { %284 = vmatprep.subr.mxu0 %v163_v8  ;;  %1458 = vmatprep.subr.mxu1 %v1963_v0  ;;  %v196_v6 = vsub.s32 0, %v2143_v5 }
  0x70   :  { %285 = vmatpush2.msra.mxu0 %v162_v10  ;;  %1265 = vmatmul.mubr.msk.f32.gmra.mxu1 %vm204_vm1, %v109_v40 }
  0x71   :  { %286 = vmatprep.subr.mxu0 %v161_v11  ;;  %1459 = vmatpush3.msra.mxu1 %v2089_v41  ;;  %v2152_v8 = vrot.slane %v2149_v7, %v196_v6 }
  0x72   :  { %287 = vmatpush2.msra.mxu0 %v160_v13  ;;  %1460 = vmatprep.subr.mxu1 %v1963_v0 }
  0x73   :  { %288 = vmatprep.subr.mxu0 %v159_v14  ;;  %1461 = vmatpush3.msra.mxu1 %v2092_v44 }
  0x74   :  { %289 = vmatpush2.msra.mxu0 %v158_v15  ;;  %436 = vmatprep.mubr.f32.mxu1 %v1963_v0 }
  0x75   :  { %290 = vmatprep.subr.mxu0 %v157_v16  ;;  %1462 = vmatprep.subr.mxu1 %v1963_v0 }
  0x76   :  { %291 = vmatpush2.msra.mxu0 %v156_v17  ;;  %1266 = vmatmul.mubr.msk.f32.gmra.mxu1 %vm204_vm1, %v112_v45 }
  0x77   :  { %292 = vmatprep.subr.mxu0 %v155_v18  ;;  %1463 = vmatpush3.msra.mxu1 %v2095_v46 }
  0x78   :  { %293 = vmatpush2.msra.mxu0 %v154_v19  ;;  %1464 = vmatprep.subr.mxu1 %v1963_v0 }
  0x79   :  { %294 = vmatprep.subr.mxu0 %v153_v20  ;;  %1465 = vmatpush3.msra.mxu1 %v2101_v50 }
  0x7a   :  { %295 = vmatpush2.msra.mxu0 %v152_v21  ;;  %441 = vmatprep.mubr.f32.mxu1 %v1963_v0 }
  0x7b   :  { %296 = vmatprep.subr.mxu0 %v151_v22  ;;  %1466 = vmatprep.subr.mxu1 %v1963_v0 }
  0x7c   :  { %297 = vmatpush2.msra.mxu0 %v150_v23  ;;  %1267 = vmatmul.mubr.msk.f32.gmra.mxu1 %vm204_vm1, %v115_v51 }
  0x7d   :  { %298 = vmatprep.subr.mxu0 %v149_v24  ;;  %1467 = vmatpush3.msra.mxu1 %v2105_v52 }
  0x7e   :  { %299 = vmatpush2.msra.mxu0 %v148_v25  ;;  %1472 = vmatprep.mubr.msk.f32.mxu1 %vm1964_vm2, %v1963_v0 }
  0x7f   :  { %301 = vmatmul.mubr.f32.vlgmr.msra.gmra.mxu0 %v92_v26  ;;  %1510 = vmatprep.subr.mxu0 %v1963_v0 }
  0x80   :  { %305 = vmatprep.mubr.f32.mxu0 %v96_v27  ;;  %1511 = vmatpush3.msra.mxu0 %v2026_v48 }
  0x81   :  { %1512 = vmatprep.subr.mxu0 %v1963_v0  ;;  %1468 = vmatprep.subr.mxu1 %v1963_v0 }
  0x82   :  { %1513 = vmatpush3.msra.mxu0 %v2032_v54  ;;  %1469 = vmatpush3.msra.mxu1 %v2111_v53 }
  0x83   :  { %306 = vmatmul.mubr.f32.gmra.mxu0 %v95_v28  ;;  %1514 = vmatprep.subr.mxu0 %v1963_v0 }
  0x84   :  { %310 = vmatprep.mubr.f32.mxu0 %v99_v29  ;;  %1515 = vmatpush3.msra.mxu0 %v2036_v57 }
  0x85   :  { %1516 = vmatprep.subr.mxu0 %v1963_v0  ;;  %1470 = vmatprep.subr.mxu1 %v1963_v0 }
  0x86   :  { %1517 = vmatpush3.msra.mxu0 %v2042_v63  ;;  %1471 = vmatpush3.msra.mxu1 %v2117_v55 }
  0x87   :  { %311 = vmatmul.mubr.f32.gmra.mxu0 %v98_v30  ;;  %1518 = vmatprep.subr.mxu0 %v1963_v0 }
  0x88   :  { %315 = vmatprep.mubr.f32.mxu0 %v102_v31  ;;  %1519 = vmatpush3.msra.mxu0 %v2046_v3 }
  0x89   :  { %1520 = vmatprep.subr.mxu0 %v1963_v0  ;;  %1475 = vmatprep.subr.mxu1 %v1963_v0 }
  0x8a   :  { %1521 = vmatpush3.msra.mxu0 %v2052_v9 }
  0x8b   :  { %316 = vmatmul.mubr.f32.gmra.mxu0 %v101_v32  ;;  %1522 = vmatprep.subr.mxu0 %v1963_v0 }
  0x8c   :  { %320 = vmatprep.mubr.f32.mxu0 %v105_v33  ;;  %1523 = vmatpush3.msra.mxu0 %v2056_v12 }
  0x8d   :  { %1524 = vmatprep.subr.mxu0 %v1963_v0 }
  0x8e   :  { %1525 = vmatpush3.msra.mxu0 %v2079_v36 }
  0x8f   :  { %321 = vmatmul.mubr.f32.gmra.mxu0 %v104_v34  ;;  %1526 = vmatprep.subr.mxu0 %v1963_v0 }
  0x90   :  { %325 = vmatprep.mubr.f32.mxu0 %v108_v37  ;;  %1527 = vmatpush3.msra.mxu0 %v2083_v39 }
  0x91   :  { %1528 = vmatprep.subr.mxu0 %v1963_v0 }
  0x92   :  { %1529 = vmatpush3.msra.mxu0 %v2089_v41 }
  0x93   :  { %326 = vmatmul.mubr.f32.gmra.mxu0 %v107_v38  ;;  %1530 = vmatprep.subr.mxu0 %v1963_v0 }
  0x94   :  { %330 = vmatprep.mubr.f32.mxu0 %v111_v42  ;;  %1531 = vmatpush3.msra.mxu0 %v2092_v44 }
  0x95   :  { %1532 = vmatprep.subr.mxu0 %v1963_v0 }
  0x96   :  { %1533 = vmatpush3.msra.mxu0 %v2095_v46 }
  0x97   :  { %331 = vmatmul.mubr.f32.gmra.mxu0 %v110_v43  ;;  %1534 = vmatprep.subr.mxu0 %v1963_v0 }
  0x98   :  { %335 = vmatprep.mubr.f32.mxu0 %v114_v47  ;;  %1535 = vmatpush3.msra.mxu0 %v2101_v50 }
  0x99   :  { %1536 = vmatprep.subr.mxu0 %v1963_v0 }
  0x9a   :  { %1537 = vmatpush3.msra.mxu0 %v2105_v52 }
  0x9b   :  { %336 = vmatmul.mubr.f32.gmra.mxu0 %v113_v49  ;;  %1538 = vmatprep.subr.mxu0 %v1963_v0 }
  0x9c   :  { %1542 = vmatprep.mubr.msk.f32.mxu0 %vm1964_vm2, %v1963_v0  ;;  %1539 = vmatpush3.msra.mxu0 %v2111_v53 }
  0x9d   :  { %1540 = vmatprep.subr.mxu0 %v1963_v0 }
  0x9e   :  { %1541 = vmatpush3.msra.mxu0 %v2117_v55 }
  0x9f   :  { %1580 = vmatprep.subr.mxu0 %v1963_v0 }
 0x113   :  { %v408_v56 = vpop.f32.mrf.mxu1 }
 0x115   :  { %v410_v58 = vpop.f32.mrf.mxu1 }
 0x118   :  { %v413_v59 = vpop.f32.mrf.mxu1 }
 0x11a   :  { %v415_v60 = vpop.f32.mrf.mxu1 }
 0x11e   :  { %v418_v61 = vpop.f32.mrf.mxu1 }
 0x120   :  { %v420_v62 = vpop.f32.mrf.mxu1 }
 0x124   :  { %v423_v1 = vpop.f32.mrf.mxu1 }
 0x126   :  { %v425_v4 = vpop.f32.mrf.mxu1 }
 0x12a   :  { %v428_v31 = vpop.f32.mrf.mxu1 }
 0x12c   :  { %v430_v34 = vpop.f32.mrf.mxu1 }
 0x130   :  { %v433_v38 = vpop.f32.mrf.mxu1 }
 0x132   :  { %v435_v43 = vpop.f32.mrf.mxu1 }
 0x133   :  { %v979_v43 = vld [vmem:[#allocation8 + $0x48] sm:$0xff] }
 0x136   :  { %v438_v49 = vpop.f32.mrf.mxu1 }
 0x138   :  { %v440_v58 = vpop.f32.mrf.mxu1 }
 0x139   :  { %v975_v58 = vld [vmem:[#allocation8 + $0x28] sm:$0xff] }
 0x13c   :  { %v443_v60 = vpop.f32.mrf.mxu1 }
 0x13e   :  { %v2210_v62 = vpop.f32.mrf.mxu1 }
 0x13f   :  { %v302_v10 = vpop.f32.mrf.mxu0 }
 0x140   :  { %v303_v11 = vadd.f32 %v302_v10, %v2152_v8 }
 0x141   :  { %v304_v13 = vpop.f32.mrf.mxu0 }
 0x142   :  { %v409_v14 = vadd.f32 %v408_v56, %v303_v11 }
 0x143   :  { %v307_v15 = vpop.f32.mrf.mxu0 }
 0x144   :  { %1804 = vtanh.f32 %v409_v14  ;;  %v308_v16 = vadd.f32 %v307_v15, %v2152_v8 }
 0x145   :  { %v309_v17 = vpop.f32.mrf.mxu0 }
 0x146   :  { %v2156_v18 = vadd.f32 %v413_v59, %v308_v16 }
 0x147   :  { %v312_v19 = vpop.f32.mrf.mxu0 }
 0x148   :  { %v313_v20 = vadd.f32 %v312_v19, %v2152_v8 }
 0x149   :  { %v314_v21 = vpop.f32.mrf.mxu0 }
 0x14a   :  { %v2159_v22 = vadd.f32 %v418_v61, %v313_v20 }
 0x14b   :  { %v317_v23 = vpop.f32.mrf.mxu0 }
 0x14c   :  { %v318_v24 = vadd.f32 %v317_v23, %v2152_v8  ;;  %v991_v23 = vld [vmem:[#allocation8 + $0xa8] sm:$0xff] }
 0x14d   :  { %v319_v25 = vpop.f32.mrf.mxu0 }
 0x14e   :  { %v2162_v26 = vadd.f32 %v423_v1, %v318_v24  ;;  %v990_v24 = vld [vmem:[#allocation8 + $0xa0] sm:$0xff]  ;;  %v989_v25 = vld [vmem:[#allocation8 + $0x98] sm:$0xff] }
 0x14f   :  { %v322_v27 = vpop.f32.mrf.mxu0 }
 0x150   :  { %v323_v30 = vadd.f32 %v322_v27, %v2152_v8  ;;  %v987_v27 = vld [vmem:[#allocation8 + $0x88] sm:$0xff] }
 0x151   :  { %v1805_v28 = vpop.eup %1804  ;;  %v324_v29 = vpop.f32.mrf.mxu0 }
 0x152   :  { %1473 = vmatmul.mubr.f32.vlgmr.msra.gmra.mxu1 %v1805_v28  ;;  %v2199_v32 = vadd.f32 %v428_v31, %v323_v30  ;;  %v986_v28 = vld [vmem:[#allocation8 + $0x80] sm:$0xff] }
 0x153   :  { %1476 = vmatpush3.msra.mxu1 %v2026_v48  ;;  %1507 = vmatprep.mubr.msk.f32.mxu1 %vm1964_vm2, %v1963_v0  ;;  %v327_v33 = vpop.f32.mrf.mxu0 }
 0x154   :  { %1477 = vmatprep.subr.mxu1 %v1963_v0  ;;  %v328_v35 = vadd.f32 %v327_v33, %v2152_v8  ;;  %v985_v33 = vld [vmem:[#allocation8 + $0x78] sm:$0xff] }
 0x155   :  { %1478 = vmatpush3.msra.mxu1 %v2032_v54  ;;  %v329_v37 = vpop.f32.mrf.mxu0 }
 0x156   :  { %1479 = vmatprep.subr.mxu1 %v1963_v0  ;;  %v2202_v40 = vadd.f32 %v433_v38, %v328_v35  ;;  %v984_v35 = vld [vmem:[#allocation8 + $0x70] sm:$0xff]  ;;  %v983_v37 = vld [vmem:[#allocation8 + $0x68] sm:$0xff]  ;;  %v982_v38 = vld [vmem:[#allocation8 + $0x60] sm:$0xff] }
 0x157   :  { %1480 = vmatpush3.msra.mxu1 %v2036_v57  ;;  %v332_v42 = vpop.f32.mrf.mxu0 }
 0x158   :  { %1481 = vmatprep.subr.mxu1 %v1963_v0  ;;  %v333_v45 = vadd.f32 %v332_v42, %v2152_v8  ;;  %v980_v42 = vld [vmem:[#allocation8 + $0x50] sm:$0xff] }
 0x159   :  { %1482 = vmatpush3.msra.mxu1 %v2042_v63  ;;  %v334_v47 = vpop.f32.mrf.mxu0 }
 0x15a   :  { %1483 = vmatprep.subr.mxu1 %v1963_v0  ;;  %v2205_v51 = vadd.f32 %v438_v49, %v333_v45  ;;  %v978_v49 = vld [vmem:[#allocation8 + $0x40] sm:$0xff] }
 0x15b   :  { %1484 = vmatpush3.msra.mxu1 %v2046_v3  ;;  %v337_v56 = vpop.f32.mrf.mxu0 }
 0x15c   :  { %1485 = vmatprep.subr.mxu1 %v1963_v0  ;;  %v338_v59 = vadd.f32 %v337_v56, %v2152_v8  ;;  %v976_v56 = vld [vmem:[#allocation8 + $0x30] sm:$0xff] }
 0x15d   :  { %1486 = vmatpush3.msra.mxu1 %v2052_v9  ;;  %v2282_v14 = vpop.f32.mrf.mxu0 }
 0x15e   :  { %1487 = vmatprep.subr.mxu1 %v1963_v0  ;;  %v2208_v61 = vadd.f32 %v443_v60, %v338_v59  ;;  %v974_v59 = vld [vmem:[#allocation8 + $0x20] sm:$0xff]  ;;  %v973_v60 = vld [vmem:[#allocation8 + $0x18] sm:$0xff] }
 0x15f   :  { %1488 = vmatpush3.msra.mxu1 %v2056_v12 }
 0x160   :  { %1489 = vmatprep.subr.mxu1 %v1963_v0 }
 0x161   :  { %1490 = vmatpush3.msra.mxu1 %v2079_v36 }
 0x162   :  { %1491 = vmatprep.subr.mxu1 %v1963_v0 }
 0x163   :  { %1492 = vmatpush3.msra.mxu1 %v2083_v39 }
 0x164   :  { %1493 = vmatprep.subr.mxu1 %v1963_v0 }
 0x165   :  { %1494 = vmatpush3.msra.mxu1 %v2089_v41 }
 0x166   :  { %1495 = vmatprep.subr.mxu1 %v1963_v0 }
 0x167   :  { %1496 = vmatpush3.msra.mxu1 %v2092_v44 }
 0x168   :  { %1497 = vmatprep.subr.mxu1 %v1963_v0 }
 0x169   :  { %1498 = vmatpush3.msra.mxu1 %v2095_v46 }
 0x16a   :  { %1499 = vmatprep.subr.mxu1 %v1963_v0 }
 0x16b   :  { %1500 = vmatpush3.msra.mxu1 %v2101_v50 }
 0x16c   :  { %1501 = vmatprep.subr.mxu1 %v1963_v0 }
 0x16d   :  { %1502 = vmatpush3.msra.mxu1 %v2105_v52 }
 0x16e   :  { %1503 = vmatprep.subr.mxu1 %v1963_v0 }
 0x16f   :  { %1504 = vmatpush3.msra.mxu1 %v2111_v53 }
 0x170   :  { %1505 = vmatprep.subr.mxu1 %v1963_v0 }
 0x171   :  { %1506 = vmatpush3.msra.mxu1 %v2117_v55 }
 0x172   :  { %1545 = vmatprep.subr.mxu1 %v1963_v0 }
 0x212   :  { %v531_v1 = vpop.f32.mrf.mxu1 }
 0x213   :  { %v535_v2 = vadd.f32 %v531_v1, %v2156_v18  ;;  %v971_v1 = vld [vmem:[#allocation8 + $0x8] sm:$0xff] }
 0x214   :  { %v1474_v4 = vpop.f32.mrf.mxu1 }
 0x215   :  { %1806 = vtanh.f32 %v535_v2  ;;  %v970_v2 = vld [vmem:[#allocation8] sm:$0xff]  ;;  %v1164_v4 = vld [vmem:[#allocation10 + $0x78] sm:$0xff] }
 0x222   :  { %v1807_v6 = vpop.eup %1806 }
 0x223   :  { %1508 = vmatmul.mubr.f32.vlgmr.msra.gmra.mxu1 %v1807_v6  ;;  %v1163_v6 = vld [vmem:[#allocation10 + $0x70] sm:$0xff] }
 0x224   :  { %1546 = vmatpush3.msra.mxu1 %v2026_v48  ;;  %1577 = vmatprep.mubr.msk.f32.mxu1 %vm1964_vm2, %v1963_v0 }
 0x225   :  { %1547 = vmatprep.subr.mxu1 %v1963_v0 }
 0x226   :  { %1548 = vmatpush3.msra.mxu1 %v2032_v54 }
 0x227   :  { %1549 = vmatprep.subr.mxu1 %v1963_v0 }
 0x228   :  { %1550 = vmatpush3.msra.mxu1 %v2036_v57 }
 0x229   :  { %1551 = vmatprep.subr.mxu1 %v1963_v0 }
 0x22a   :  { %1552 = vmatpush3.msra.mxu1 %v2042_v63 }
 0x22b   :  { %1553 = vmatprep.subr.mxu1 %v1963_v0 }
 0x22c   :  { %1554 = vmatpush3.msra.mxu1 %v2046_v3 }
 0x22d   :  { %1555 = vmatprep.subr.mxu1 %v1963_v0 }
 0x22e   :  { %1556 = vmatpush3.msra.mxu1 %v2052_v9 }
 0x22f   :  { %1557 = vmatprep.subr.mxu1 %v1963_v0 }
 0x230   :  { %1558 = vmatpush3.msra.mxu1 %v2056_v12 }
 0x231   :  { %1559 = vmatprep.subr.mxu1 %v1963_v0 }
 0x232   :  { %1560 = vmatpush3.msra.mxu1 %v2079_v36 }
 0x233   :  { %1561 = vmatprep.subr.mxu1 %v1963_v0 }
 0x234   :  { %1562 = vmatpush3.msra.mxu1 %v2083_v39 }
 0x235   :  { %1563 = vmatprep.subr.mxu1 %v1963_v0 }
 0x236   :  { %1564 = vmatpush3.msra.mxu1 %v2089_v41 }
 0x237   :  { %1565 = vmatprep.subr.mxu1 %v1963_v0 }
 0x238   :  { %1566 = vmatpush3.msra.mxu1 %v2092_v44 }
 0x239   :  { %1567 = vmatprep.subr.mxu1 %v1963_v0 }
 0x23a   :  { %1568 = vmatpush3.msra.mxu1 %v2095_v46 }
 0x23b   :  { %1569 = vmatprep.subr.mxu1 %v1963_v0 }
 0x23c   :  { %1570 = vmatpush3.msra.mxu1 %v2101_v50 }
 0x23d   :  { %1571 = vmatprep.subr.mxu1 %v1963_v0 }
 0x23e   :  { %1572 = vmatpush3.msra.mxu1 %v2105_v52 }
 0x23f   :  { %1573 = vmatprep.subr.mxu1 %v1963_v0 }
 0x240   :  { %1574 = vmatpush3.msra.mxu1 %v2111_v53 }
 0x241   :  { %1575 = vmatprep.subr.mxu1 %v1963_v0 }
 0x242   :  { %1576 = vmatpush3.msra.mxu1 %v2117_v55 }
 0x243   :  { %1615 = vmatprep.subr.mxu1 %v1963_v0 }
 0x2e3   :  { %v603_v8 = vpop.f32.mrf.mxu1 }
 0x2e4   :  { %v607_v10 = vadd.f32 %v603_v8, %v2159_v22  ;;  %v1162_v8 = vld [vmem:[#allocation10 + $0x68] sm:$0xff] }
 0x2e5   :  { %v1509_v11 = vpop.f32.mrf.mxu1 }
 0x2e6   :  { %1808 = vtanh.f32 %v607_v10  ;;  %v1161_v10 = vld [vmem:[#allocation10 + $0x60] sm:$0xff]  ;;  %v1160_v11 = vld [vmem:[#allocation10 + $0x58] sm:$0xff] }
 0x2f3   :  { %v1809_v13 = vpop.eup %1808 }
 0x2f4   :  { %1543 = vmatmul.mubr.f32.vlgmr.msra.gmra.mxu0 %v1809_v13  ;;  %v1159_v13 = vld [vmem:[#allocation10 + $0x50] sm:$0xff] }
 0x2f5   :  { %1581 = vmatpush3.msra.mxu0 %v2026_v48  ;;  %1612 = vmatprep.mubr.msk.f32.mxu0 %vm1964_vm2, %v1963_v0 }
 0x2f6   :  { %1582 = vmatprep.subr.mxu0 %v1963_v0 }
 0x2f7   :  { %1583 = vmatpush3.msra.mxu0 %v2032_v54 }
 0x2f8   :  { %1584 = vmatprep.subr.mxu0 %v1963_v0 }
 0x2f9   :  { %1585 = vmatpush3.msra.mxu0 %v2036_v57 }
 0x2fa   :  { %1586 = vmatprep.subr.mxu0 %v1963_v0 }
 0x2fb   :  { %1587 = vmatpush3.msra.mxu0 %v2042_v63 }
 0x2fc   :  { %1588 = vmatprep.subr.mxu0 %v1963_v0 }
 0x2fd   :  { %1589 = vmatpush3.msra.mxu0 %v2046_v3 }
 0x2fe   :  { %1590 = vmatprep.subr.mxu0 %v1963_v0 }
 0x2ff   :  { %1591 = vmatpush3.msra.mxu0 %v2052_v9 }
 0x300   :  { %1592 = vmatprep.subr.mxu0 %v1963_v0 }
 0x301   :  { %1593 = vmatpush3.msra.mxu0 %v2056_v12 }
 0x302   :  { %1594 = vmatprep.subr.mxu0 %v1963_v0 }
 0x303   :  { %1595 = vmatpush3.msra.mxu0 %v2079_v36 }
 0x304   :  { %1596 = vmatprep.subr.mxu0 %v1963_v0 }
 0x305   :  { %1597 = vmatpush3.msra.mxu0 %v2083_v39 }
 0x306   :  { %1598 = vmatprep.subr.mxu0 %v1963_v0 }
 0x307   :  { %1599 = vmatpush3.msra.mxu0 %v2089_v41 }
 0x308   :  { %1600 = vmatprep.subr.mxu0 %v1963_v0 }
 0x309   :  { %1601 = vmatpush3.msra.mxu0 %v2092_v44 }
 0x30a   :  { %1602 = vmatprep.subr.mxu0 %v1963_v0 }
 0x30b   :  { %1603 = vmatpush3.msra.mxu0 %v2095_v46 }
 0x30c   :  { %1604 = vmatprep.subr.mxu0 %v1963_v0 }
 0x30d   :  { %1605 = vmatpush3.msra.mxu0 %v2101_v50 }
 0x30e   :  { %1606 = vmatprep.subr.mxu0 %v1963_v0 }
 0x30f   :  { %1607 = vmatpush3.msra.mxu0 %v2105_v52 }
 0x310   :  { %1608 = vmatprep.subr.mxu0 %v1963_v0 }
 0x311   :  { %1609 = vmatpush3.msra.mxu0 %v2111_v53 }
 0x312   :  { %1610 = vmatprep.subr.mxu0 %v1963_v0 }
 0x313   :  { %1611 = vmatpush3.msra.mxu0 %v2117_v55 }
 0x314   :  { %1650 = vmatprep.subr.mxu0 %v1963_v0 }
 0x3b4   :  { %v675_v15 = vpop.f32.mrf.mxu0 }
 0x3b5   :  { %v679_v16 = vadd.f32 %v675_v15, %v2162_v26  ;;  %v988_v26 = vld [vmem:[#allocation8 + $0x90] sm:$0xff] }
 0x3b6   :  { %v1544_v17 = vpop.f32.mrf.mxu0 }
 0x3b7   :  { %1810 = vtanh.f32 %v679_v16 }
 0x3c4   :  { %v1811_v18 = vpop.eup %1810 }
 0x3c5   :  { %1578 = vmatmul.mubr.f32.vlgmr.msra.gmra.mxu1 %v1811_v18  ;;  %v1158_v18 = vld [vmem:[#allocation10 + $0x48] sm:$0xff] }
 0x3c6   :  { %1616 = vmatpush3.msra.mxu1 %v2026_v48  ;;  %1647 = vmatprep.mubr.msk.f32.mxu1 %vm1964_vm2, %v1963_v0 }
 0x3c7   :  { %1617 = vmatprep.subr.mxu1 %v1963_v0 }
 0x3c8   :  { %1618 = vmatpush3.msra.mxu1 %v2032_v54 }
 0x3c9   :  { %1619 = vmatprep.subr.mxu1 %v1963_v0 }
 0x3ca   :  { %1620 = vmatpush3.msra.mxu1 %v2036_v57 }
 0x3cb   :  { %1621 = vmatprep.subr.mxu1 %v1963_v0 }
 0x3cc   :  { %1622 = vmatpush3.msra.mxu1 %v2042_v63 }
 0x3cd   :  { %1623 = vmatprep.subr.mxu1 %v1963_v0 }
 0x3ce   :  { %1624 = vmatpush3.msra.mxu1 %v2046_v3 }
 0x3cf   :  { %1625 = vmatprep.subr.mxu1 %v1963_v0 }
 0x3d0   :  { %1626 = vmatpush3.msra.mxu1 %v2052_v9 }
 0x3d1   :  { %1627 = vmatprep.subr.mxu1 %v1963_v0 }
 0x3d2   :  { %1628 = vmatpush3.msra.mxu1 %v2056_v12 }
 0x3d3   :  { %1629 = vmatprep.subr.mxu1 %v1963_v0 }
 0x3d4   :  { %1630 = vmatpush3.msra.mxu1 %v2079_v36 }
 0x3d5   :  { %1631 = vmatprep.subr.mxu1 %v1963_v0 }
 0x3d6   :  { %1632 = vmatpush3.msra.mxu1 %v2083_v39 }
 0x3d7   :  { %1633 = vmatprep.subr.mxu1 %v1963_v0 }
 0x3d8   :  { %1634 = vmatpush3.msra.mxu1 %v2089_v41 }
 0x3d9   :  { %1635 = vmatprep.subr.mxu1 %v1963_v0 }
 0x3da   :  { %1636 = vmatpush3.msra.mxu1 %v2092_v44 }
 0x3db   :  { %1637 = vmatprep.subr.mxu1 %v1963_v0 }
 0x3dc   :  { %1638 = vmatpush3.msra.mxu1 %v2095_v46 }
 0x3dd   :  { %1639 = vmatprep.subr.mxu1 %v1963_v0 }
 0x3de   :  { %1640 = vmatpush3.msra.mxu1 %v2101_v50 }
 0x3df   :  { %1641 = vmatprep.subr.mxu1 %v1963_v0 }
 0x3e0   :  { %1642 = vmatpush3.msra.mxu1 %v2105_v52 }
 0x3e1   :  { %1643 = vmatprep.subr.mxu1 %v1963_v0 }
 0x3e2   :  { %1644 = vmatpush3.msra.mxu1 %v2111_v53 }
 0x3e3   :  { %1645 = vmatprep.subr.mxu1 %v1963_v0 }
 0x3e4   :  { %1646 = vmatpush3.msra.mxu1 %v2117_v55 }
 0x3e5   :  { %1685 = vmatprep.subr.mxu1 %v1963_v0 }
 0x485   :  { %v747_v19 = vpop.f32.mrf.mxu1 }
 0x486   :  { %v751_v20 = vadd.f32 %v747_v19, %v2199_v32  ;;  %v1157_v19 = vld [vmem:[#allocation10 + $0x40] sm:$0xff] }
 0x487   :  { %v1579_v21 = vpop.f32.mrf.mxu1 }
 0x488   :  { %1812 = vtanh.f32 %v751_v20  ;;  %v1156_v20 = vld [vmem:[#allocation10 + $0x38] sm:$0xff]  ;;  %v1155_v21 = vld [vmem:[#allocation10 + $0x30] sm:$0xff] }
 0x495   :  { %v1813_v22 = vpop.eup %1812 }
 0x496   :  { %1613 = vmatmul.mubr.f32.vlgmr.msra.gmra.mxu0 %v1813_v22  ;;  %v1154_v22 = vld [vmem:[#allocation10 + $0x28] sm:$0xff] }
 0x497   :  { %1651 = vmatpush3.msra.mxu0 %v2026_v48  ;;  %1682 = vmatprep.mubr.msk.f32.mxu0 %vm1964_vm2, %v1963_v0 }
 0x498   :  { %1652 = vmatprep.subr.mxu0 %v1963_v0 }
 0x499   :  { %1653 = vmatpush3.msra.mxu0 %v2032_v54 }
 0x49a   :  { %1654 = vmatprep.subr.mxu0 %v1963_v0 }
 0x49b   :  { %1655 = vmatpush3.msra.mxu0 %v2036_v57 }
 0x49c   :  { %1656 = vmatprep.subr.mxu0 %v1963_v0 }
 0x49d   :  { %1657 = vmatpush3.msra.mxu0 %v2042_v63  ;;  %v1001_v63 = vld [vmem:[#allocation8 + $0xf8] sm:$0xff] }
 0x49e   :  { %1658 = vmatprep.subr.mxu0 %v1963_v0 }
 0x49f   :  { %1659 = vmatpush3.msra.mxu0 %v2046_v3 }
 0x4a0   :  { %1660 = vmatprep.subr.mxu0 %v1963_v0 }
 0x4a1   :  { %1661 = vmatpush3.msra.mxu0 %v2052_v9  ;;  %v1000_v9 = vld [vmem:[#allocation8 + $0xf0] sm:$0xff] }
 0x4a2   :  { %1662 = vmatprep.subr.mxu0 %v1963_v0 }
 0x4a3   :  { %1663 = vmatpush3.msra.mxu0 %v2056_v12  ;;  %v200_v12 = vsub.s32 1, %v2143_v5  ;;  %v993_v5 = vld [vmem:[#allocation8 + $0xb8] sm:$0xff] }
 0x4a4   :  { %1664 = vmatprep.subr.mxu0 %v1963_v0 }
 0x4a5   :  { %1665 = vmatpush3.msra.mxu0 %v2079_v36  ;;  %v999_v36 = vld [vmem:[#allocation8 + $0xe8] sm:$0xff] }
 0x4a6   :  { %1666 = vmatprep.subr.mxu0 %v1963_v0 }
 0x4a7   :  { %1667 = vmatpush3.msra.mxu0 %v2083_v39  ;;  %v998_v39 = vld [vmem:[#allocation8 + $0xe0] sm:$0xff] }
 0x4a8   :  { %1668 = vmatprep.subr.mxu0 %v1963_v0 }
 0x4a9   :  { %1669 = vmatpush3.msra.mxu0 %v2089_v41  ;;  %v201_v41 = vrot.slane %v2149_v7, %v200_v12  ;;  %v992_v7 = vld [vmem:[#allocation8 + $0xb0] sm:$0xff] }
 0x4aa   :  { %1670 = vmatprep.subr.mxu0 %v1963_v0 }
 0x4ab   :  { %1671 = vmatpush3.msra.mxu0 %v2092_v44  ;;  %v997_v44 = vld [vmem:[#allocation8 + $0xd8] sm:$0xff] }
 0x4ac   :  { %1672 = vmatprep.subr.mxu0 %v1963_v0 }
 0x4ad   :  { %1673 = vmatpush3.msra.mxu0 %v2095_v46  ;;  %v996_v46 = vld [vmem:[#allocation8 + $0xd0] sm:$0xff] }
 0x4ae   :  { %1674 = vmatprep.subr.mxu0 %v1963_v0 }
 0x4af   :  { %1675 = vmatpush3.msra.mxu0 %v2101_v50  ;;  %v340_v50 = vadd.f32 %v2282_v14, %v201_v41 }
 0x4b0   :  { %1676 = vmatprep.subr.mxu0 %v1963_v0 }
 0x4b1   :  { %1677 = vmatpush3.msra.mxu0 %v2105_v52  ;;  %v995_v52 = vld [vmem:[#allocation8 + $0xc8] sm:$0xff] }
 0x4b2   :  { %1678 = vmatprep.subr.mxu0 %v1963_v0 }
 0x4b3   :  { %1679 = vmatpush3.msra.mxu0 %v2111_v53  ;;  %v994_v53 = vld [vmem:[#allocation8 + $0xc0] sm:$0xff] }
 0x4b4   :  { %1680 = vmatprep.subr.mxu0 %v1963_v0 }
 0x4b5   :  { %1681 = vmatpush3.msra.mxu0 %v2117_v55  ;;  %v446_v55 = vadd.f32 %v2210_v62, %v340_v50  ;;  %v972_v62 = vld [vmem:[#allocation8 + $0x10] sm:$0xff] }
 0x4b6   :  { %1720 = vmatprep.subr.mxu0 %v1963_v0 }
 0x556   :  { %v819_v48 = vpop.f32.mrf.mxu0 }
 0x557   :  { %v823_v54 = vadd.f32 %v819_v48, %v2202_v40  ;;  %v981_v40 = vld [vmem:[#allocation8 + $0x58] sm:$0xff] }
 0x558   :  { %v1614_v57 = vpop.f32.mrf.mxu0  ;;  %v1152_v48 = vld [vmem:[#allocation10 + $0x18] sm:$0xff] }
 0x559   :  { %1814 = vtanh.f32 %v823_v54  ;;  %v1151_v54 = vld [vmem:[#allocation10 + $0x10] sm:$0xff]  ;;  %v1150_v57 = vld [vmem:[#allocation10 + $0x8] sm:$0xff] }
 0x55a   :  { %1816 = vtanh.f32 %v446_v55 }
 0x566   :  { %v1815_v3 = vpop.eup %1814 }
 0x567   :  { %1648 = vmatmul.mubr.f32.vlgmr.msra.gmra.mxu1 %v1815_v3  ;;  %v1817_v29 = vpop.eup %1816 }
 0x568   :  { %1686 = vmatpush3.msra.mxu1 %v1001_v63  ;;  %1717 = vmatprep.mubr.msk.f32.mxu1 %vm1964_vm2, %v1963_v0  ;;  %v1149_v63 = vld [vmem:[#allocation10] sm:$0xff] }
 0x569   :  { %1687 = vmatprep.subr.mxu1 %v1963_v0 }
 0x56a   :  { %1688 = vmatpush3.msra.mxu1 %v1000_v9  ;;  %v1268_v9 = vld [vmem:[%s2430_s5 + $0x1] ss:$0 sm:$0xff] }
 0x56b   :  { %1689 = vmatprep.subr.mxu1 %v1963_v0 }
 0x56c   :  { %1690 = vmatpush3.msra.mxu1 %v999_v36 }
 0x56d   :  { %1691 = vmatprep.subr.mxu1 %v1963_v0 }
 0x56e   :  { %1692 = vmatpush3.msra.mxu1 %v998_v39 }
 0x56f   :  { %1693 = vmatprep.subr.mxu1 %v1963_v0 }
 0x570   :  { %1694 = vmatpush3.msra.mxu1 %v997_v44  ;;  %v1269_v44 = vld [vmem:[%s2430_s5 + $0x3] ss:$0 sm:$0xff] }
 0x571   :  { %1695 = vmatprep.subr.mxu1 %v1963_v0 }
 0x572   :  { %1696 = vmatpush3.msra.mxu1 %v996_v46 }
 0x573   :  { %1697 = vmatprep.subr.mxu1 %v1963_v0 }
 0x574   :  { %1698 = vmatpush3.msra.mxu1 %v995_v52 }
 0x575   :  { %1699 = vmatprep.subr.mxu1 %v1963_v0 }
 0x576   :  { %1700 = vmatpush3.msra.mxu1 %v994_v53 }
 0x577   :  { %1701 = vmatprep.subr.mxu1 %v1963_v0 }
 0x578   :  { %1702 = vmatpush3.msra.mxu1 %v993_v5 }
 0x579   :  { %1703 = vmatprep.subr.mxu1 %v1963_v0 }
 0x57a   :  { %1704 = vmatpush3.msra.mxu1 %v992_v7 }
 0x57b   :  { %1705 = vmatprep.subr.mxu1 %v1963_v0 }
 0x57c   :  { %1706 = vmatpush3.msra.mxu1 %v991_v23 }
 0x57d   :  { %1707 = vmatprep.subr.mxu1 %v1963_v0 }
 0x57e   :  { %1708 = vmatpush3.msra.mxu1 %v990_v24 }
 0x57f   :  { %1709 = vmatprep.subr.mxu1 %v1963_v0 }
 0x580   :  { %1710 = vmatpush3.msra.mxu1 %v989_v25 }
 0x581   :  { %1711 = vmatprep.subr.mxu1 %v1963_v0 }
 0x582   :  { %1712 = vmatpush3.msra.mxu1 %v988_v26 }
 0x583   :  { %1713 = vmatprep.subr.mxu1 %v1963_v0 }
 0x584   :  { %1714 = vmatpush3.msra.mxu1 %v987_v27 }
 0x585   :  { %1715 = vmatprep.subr.mxu1 %v1963_v0 }
 0x586   :  { %1716 = vmatpush3.msra.mxu1 %v986_v28 }
 0x587   :  { %1718 = vmatmul.mubr.f32.vlgmr.msra.gmra.mxu1 %v1817_v29  ;;  %1755 = vmatprep.subr.mxu1 %v1963_v0 }
 0x588   :  { %1787 = vmatprep.mubr.msk.f32.mxu1 %vm1964_vm2, %v1963_v0  ;;  %1756 = vmatpush3.msra.mxu1 %v1164_v4 }
 0x589   :  { %1757 = vmatprep.subr.mxu1 %v1963_v0 }
 0x58a   :  { %1758 = vmatpush3.msra.mxu1 %v1163_v6 }
 0x58b   :  { %1759 = vmatprep.subr.mxu1 %v1963_v0 }
 0x58c   :  { %1760 = vmatpush3.msra.mxu1 %v1162_v8 }
 0x58d   :  { %1761 = vmatprep.subr.mxu1 %v1963_v0 }
 0x58e   :  { %1762 = vmatpush3.msra.mxu1 %v1161_v10 }
 0x58f   :  { %1763 = vmatprep.subr.mxu1 %v1963_v0 }
 0x590   :  { %1764 = vmatpush3.msra.mxu1 %v1160_v11 }
 0x591   :  { %1765 = vmatprep.subr.mxu1 %v1963_v0 }
 0x592   :  { %1766 = vmatpush3.msra.mxu1 %v1159_v13 }
 0x593   :  { %1767 = vmatprep.subr.mxu1 %v1963_v0 }
 0x594   :  { %1768 = vmatpush3.msra.mxu1 %v1158_v18 }
 0x595   :  { %1769 = vmatprep.subr.mxu1 %v1963_v0 }
 0x596   :  { %1770 = vmatpush3.msra.mxu1 %v1157_v19 }
 0x597   :  { %1771 = vmatprep.subr.mxu1 %v1963_v0 }
 0x598   :  { %1772 = vmatpush3.msra.mxu1 %v1156_v20 }
 0x599   :  { %1773 = vmatprep.subr.mxu1 %v1963_v0 }
 0x59a   :  { %1774 = vmatpush3.msra.mxu1 %v1155_v21 }
 0x59b   :  { %1775 = vmatprep.subr.mxu1 %v1963_v0 }
 0x59c   :  { %1776 = vmatpush3.msra.mxu1 %v1154_v22 }
 0x59d   :  { %1777 = vmatprep.subr.mxu1 %v1963_v0 }
 0x627   :  { %v891_v30 = vpop.f32.mrf.mxu1 }
 0x628   :  { %v895_v31 = vadd.f32 %v891_v30, %v2205_v51  ;;  %v977_v51 = vld [vmem:[#allocation8 + $0x38] sm:$0xff] }
 0x629   :  { %v1649_v32 = vpop.f32.mrf.mxu1 }
 0x62a   :  { %1818 = vtanh.f32 %v895_v31 }
 0x637   :  { %v1819_v34 = vpop.eup %1818 }
 0x638   :  { %1683 = vmatmul.mubr.f32.vlgmr.msra.gmra.mxu0 %v1819_v34 }
 0x639   :  { %1721 = vmatpush3.msra.mxu0 %v985_v33  ;;  %1752 = vmatprep.mubr.msk.f32.mxu0 %vm1964_vm2, %v1963_v0 }
 0x63a   :  { %1722 = vmatprep.subr.mxu0 %v1963_v0 }
 0x63b   :  { %1723 = vmatpush3.msra.mxu0 %v984_v35 }
 0x63c   :  { %1724 = vmatprep.subr.mxu0 %v1963_v0 }
 0x63d   :  { %1725 = vmatpush3.msra.mxu0 %v983_v37 }
 0x63e   :  { %1726 = vmatprep.subr.mxu0 %v1963_v0 }
 0x63f   :  { %1727 = vmatpush3.msra.mxu0 %v982_v38 }
 0x640   :  { %1728 = vmatprep.subr.mxu0 %v1963_v0 }
 0x641   :  { %1729 = vmatpush3.msra.mxu0 %v981_v40 }
 0x642   :  { %1730 = vmatprep.subr.mxu0 %v1963_v0 }
 0x643   :  { %1731 = vmatpush3.msra.mxu0 %v980_v42 }
 0x644   :  { %1732 = vmatprep.subr.mxu0 %v1963_v0 }
 0x645   :  { %1733 = vmatpush3.msra.mxu0 %v979_v43 }
 0x646   :  { %1734 = vmatprep.subr.mxu0 %v1963_v0 }
 0x647   :  { %v2389_v45 = vpop.f32.mrf.mxu1  ;;  %1735 = vmatpush3.msra.mxu0 %v978_v49 }
 0x648   :  { %1736 = vmatprep.subr.mxu0 %v1963_v0 }
 0x649   :  { %v1719_v47 = vpop.f32.mrf.mxu1  ;;  %1737 = vmatpush3.msra.mxu0 %v977_v51 }
 0x64a   :  { %1738 = vmatprep.subr.mxu0 %v1963_v0 }
 0x64b   :  { %1739 = vmatpush3.msra.mxu0 %v976_v56 }
 0x64c   :  { %1740 = vmatprep.subr.mxu0 %v1963_v0 }
 0x64d   :  { %1741 = vmatpush3.msra.mxu0 %v975_v58 }
 0x64e   :  { %1742 = vmatprep.subr.mxu0 %v1963_v0 }
 0x64f   :  { %1743 = vmatpush3.msra.mxu0 %v974_v59 }
 0x650   :  { %1744 = vmatprep.subr.mxu0 %v1963_v0 }
 0x651   :  { %1745 = vmatpush3.msra.mxu0 %v973_v60 }
 0x652   :  { %1746 = vmatprep.subr.mxu0 %v1963_v0 }
 0x653   :  { %1747 = vmatpush3.msra.mxu0 %v972_v62 }
 0x654   :  { %1748 = vmatprep.subr.mxu0 %v1963_v0 }
 0x655   :  { %1749 = vmatpush3.msra.mxu0 %v971_v1 }
 0x656   :  { %1750 = vmatprep.subr.mxu0 %v1963_v0 }
 0x657   :  { %1751 = vmatpush3.msra.mxu0 %v970_v2 }
 0x6f8   :  { %v963_v14 = vpop.f32.mrf.mxu0 }
 0x6f9   :  { %v967_v15 = vadd.f32 %v963_v14, %v2208_v61  ;;  %v1153_v61 = vld [vmem:[#allocation10 + $0x20] sm:$0xff] }
 0x6fa   :  { %v1684_v16 = vpop.f32.mrf.mxu0  ;;  %1778 = vmatpush3.msra.mxu1 %v1153_v61 }
 0x6fb   :  { %1820 = vtanh.f32 %v967_v15  ;;  %1779 = vmatprep.subr.mxu1 %v1963_v0 }
 0x6fc   :  { %1780 = vmatpush3.msra.mxu1 %v1152_v48 }
 0x6fd   :  { %1781 = vmatprep.subr.mxu1 %v1963_v0 }
 0x6fe   :  { %1782 = vmatpush3.msra.mxu1 %v1151_v54 }
 0x6ff   :  { %1783 = vmatprep.subr.mxu1 %v1963_v0 }
 0x700   :  { %1784 = vmatpush3.msra.mxu1 %v1150_v57 }
 0x701   :  { %1785 = vmatprep.subr.mxu1 %v1963_v0 }
 0x702   :  { %1786 = vmatpush3.msra.mxu1 %v1149_v63 }
 0x708   :  { %v1821_v17 = vpop.eup %1820 }
 0x709   :  { %1753 = vmatmul.mubr.f32.vlgmr.msra.gmra.mxu0 %v1821_v17 }
 0x7c9   :  { %v1138_v3 = vpop.f32.mrf.mxu0 }
 0x7ca   :  { %v1139_v12 = vadd.f32 %v1138_v3, %v2389_v45 }
 0x7cb   :  { %v1754_v36 = vpop.f32.mrf.mxu0 }
 0x7cc   :  { %v1147_v39 = vadd.f32 %v1268_v9, %v1139_v12 }
 0x7ce   :  { %1822 = vtanh.f32 %v1147_v39 }
 0x7db   :  { %v1823_v41 = vpop.eup %1822 }
 0x7dc   :  { %1788 = vmatmul.mubr.f32.vlgmr.msra.gmra.mxu1 %v1823_v41 }
 0x89c   :  { %v1236_v0 = vpop.f32.mrf.mxu1 }
 0x89d   :  { %v1237_v46 = vadd.f32 %v1269_v44, %v1236_v0 }
 0x89e   :  { %v1789_v50 = vpop.f32.mrf.mxu1 }
 0x89f   :  { %1240 = vst [vmem:[#allocation11] sm:$0xff] %v1237_v46 }
 0x8a0   :  { %1935 = shalt.err (!%p1932_p1)
}
 0x8a1   :  { %1250 = dma.vmem_to_hbm [thread:$0]  %s1248_s30, 128, %s2431_s6, [#allocation4]  }
 0x8a2   :  { %1950 = dma.done.wait [#allocation4], 128  }
 0x8a3   :  { %1951 = vsyncadd [#allocation4], 4294967168 }
 0x8a4   :  { %1254 = vsyncpa [#allocation3], 1 }
 0x8a5   :  { %1255 = vsyncpa [#allocation6], 1 }
 0x8a6   :  { %1256 = vsyncpa [#allocation9], 1 }
 0x8a7   :  { %1257 = vsyncpa [#allocation4], 1 }

</bundles_post_ra>
